<compile_context>
chip_gen: v7x
topology: tpu7x:2x2x1
jax: 0.10.0
libtpu: 0.0.40
codegen_flags: <defaults>
</compile_context>

<pallas_src>
import jax
import jax.numpy as jnp
from jax.experimental import pallas as pl
from jax.experimental.pallas import tpu as pltpu


# ----------------------------------------------------------------------------
# Pallas kernel: adaptive mask + depthwise 3x3 + pointwise 1x1 (+BN-folded, +ReLU)
# ----------------------------------------------------------------------------
def _make_block_kernel(H, W, Cin, Cout, relu):
    HW = H * W

    def kernel(x_ref, dw_w_ref, dw_b_ref, pw_w_ref, pw_b_ref, mask_ref, o_ref):
        x = x_ref[0]                                         # (Cin, HW) f32

        # adaptive sparse mask: keep x where |x| > 0.1 (single VPU select)
        masked = jnp.where(jnp.abs(x) > 0.1, x, 0.0)

        # hoisted loads (no per-tap tiny VMEM reads / un-CSE'd broadcasts)
        dw = dw_w_ref[...]                                   # (Cin, 9)
        tmask = mask_ref[...]                                # (9, HW) 0/1 border masks

        # depthwise 3x3 conv, padding=1, groups=Cin:
        #   out[c, p] = sum_k dw[c, k] * masked[c, p + s_k],  s_k = dy*W + dx,
        # with out-of-image taps zeroed by the precomputed border mask.
        acc = jnp.zeros((Cin, HW), jnp.float32)
        for dy in (-1, 0, 1):
            for dx in (-1, 0, 1):
                k = (dy + 1) * 3 + (dx + 1)
                s = dy * W + dx
                if s == 0:
                    tap = masked
                else:
                    # out[p] = masked[(p + s) % HW]  (wrap killed by tmask)
                    tap = pltpu.roll(masked, shift=(-s) % HW, axis=1)
                w_k = dw[:, k:k + 1]                         # (Cin, 1) per-channel weight
                m_k = tmask[k:k + 1, :]                      # (1, HW) validity
                acc = acc + tap * m_k * w_k
        acc = acc + dw_b_ref[...]                            # (Cin, 1) bias broadcast

        # pointwise 1x1 conv (+ folded BN) as MXU matmul: (Cout,Cin)@(Cin,HW)
        y = jnp.dot(pw_w_ref[...], acc, preferred_element_type=jnp.float32)
        y = y + pw_b_ref[...]                                # (Cout, 1) bias broadcast
        if relu:
            y = jnp.maximum(y, 0.0)

        o_ref[0] = y.astype(o_ref.dtype)                     # lane-dense (Cout, HW) store

    return kernel


# ----------------------------------------------------------------------------
# Wrapper: AdaptiveSparseConvBlock.forward
# ----------------------------------------------------------------------------
def adaptive_sparse_conv_block(x_nchw, dw_w, dw_b, pw_w, pw_b,
                               bn_params=None, activation=False):
    """Forward of AdaptiveSparseConvBlock.

    x_nchw: (B, Cin, H, W) f32   (PyTorch NCHW layout)
    dw_w:   (Cin, 3, 3)  depthwise weights (PyTorch (Cin,1,3,3) squeezed)
    dw_b:   (Cin,)       depthwise bias
    pw_w:   (Cout, Cin)  pointwise weights (PyTorch (Cout,Cin,1,1) squeezed)
    pw_b:   (Cout,)      pointwise bias
    bn_params: None or (gamma, beta, running_mean, running_var, eps)  [eval-mode BN]
    activation: fuse ReLU if True
    Returns (B, Cout, H, W) f32.
    """
    B, Cin, H, W = x_nchw.shape
    Cout = pw_w.shape[0]
    HW = H * W

    # Fold eval-mode BatchNorm into the pointwise conv (exact).
    if bn_params is not None:
        gamma, beta, mean, var, eps = bn_params
        scale = gamma * jax.lax.rsqrt(var + eps)
        pw_w_eff = pw_w * scale[:, None]
        pw_b_eff = (pw_b - mean) * scale + beta
    else:
        pw_w_eff, pw_b_eff = pw_w, pw_b

    # Precompute 0/1 border-validity masks for the 9 depthwise taps
    # (flattened HW layout), so the kernel needs no in-kernel iota/div/mod.
    hh, ww = jnp.meshgrid(jnp.arange(H), jnp.arange(W), indexing="ij")
    rows = []
    for dy in (-1, 0, 1):
        for dx in (-1, 0, 1):
            ok = ((hh + dy >= 0) & (hh + dy < H) &
                  (ww + dx >= 0) & (ww + dx < W))
            rows.append(ok.reshape(HW))
    tap_mask = jnp.stack(rows, axis=0).astype(jnp.float32)          # (9, HW)

    x_flat = x_nchw.reshape(B, Cin, HW).astype(jnp.float32)
    dw_w2 = dw_w.reshape(Cin, 9).astype(jnp.float32)
    dw_b2 = dw_b.reshape(Cin, 1).astype(jnp.float32)
    pw_w2 = pw_w_eff.astype(jnp.float32)
    pw_b2 = pw_b_eff.reshape(Cout, 1).astype(jnp.float32)

    kernel = _make_block_kernel(H, W, Cin, Cout, relu=activation)
    out = pl.pallas_call(
        kernel,
        out_shape=jax.ShapeDtypeStruct((B, Cout, HW), jnp.float32),
        grid_spec=pltpu.PrefetchScalarGridSpec(
            num_scalar_prefetch=0,
            grid=(B,),
            in_specs=[
                pl.BlockSpec((1, Cin, HW), lambda b: (b, 0, 0)),
                pl.BlockSpec((Cin, 9), lambda b: (0, 0)),
                pl.BlockSpec((Cin, 1), lambda b: (0, 0)),
                pl.BlockSpec((Cout, Cin), lambda b: (0, 0)),
                pl.BlockSpec((Cout, 1), lambda b: (0, 0)),
                pl.BlockSpec((9, HW), lambda b: (0, 0)),
            ],
            out_specs=pl.BlockSpec((1, Cout, HW), lambda b: (b, 0, 0)),
        ),
        compiler_params=pltpu.CompilerParams(
            dimension_semantics=("parallel",)),   # batch axis is independent
    )(x_flat, dw_w2, dw_b2, pw_w2, pw_b2, tap_mask)
    return out.reshape(B, Cout, H, W)


# ----------------------------------------------------------------------------
# Pure-JAX reference (validation only)
# ----------------------------------------------------------------------------
def _ref_block(x_nchw, dw_w, dw_b, pw_w, pw_b, bn_params=None, activation=False):
    B, Cin, H, W = x_nchw.shape
    x = jnp.transpose(x_nchw, (0, 2, 3, 1))                  # NHWC
    x = jnp.where(jnp.abs(x) > 0.1, x, 0.0)
    k = jnp.transpose(dw_w, (1, 2, 0))[:, :, None, :]        # (3,3,1,Cin) HWIO
    y = jax.lax.conv_general_dilated(
        x, k, (1, 1), "SAME",
        dimension_numbers=("NHWC", "HWIO", "NHWC"),
        feature_group_count=Cin)
    y = y + dw_b.reshape(1, 1, 1, Cin)
    y = jnp.einsum("bhwc,oc->bhwo", y, pw_w) + pw_b.reshape(1, 1, 1, -1)
    if bn_params is not None:
        gamma, beta, mean, var, eps = bn_params
        y = (y - mean) / jnp.sqrt(var + eps) * gamma + beta
    if activation:
        y = jnp.maximum(y, 0.0)
    return jnp.transpose(y, (0, 3, 1, 2))                    # back to NCHW


# ----------------------------------------------------------------------------
if __name__ == "__main__":
    B, Cin, Cout, H, W = 2, 16, 32, 16, 16

    key = jax.random.PRNGKey(0)
    kx, k1, k2, k3, k4, k5, k6 = jax.random.split(key, 7)
    x = jax.random.normal(kx, (B, Cin, H, W), dtype=jnp.float32)
    dw_w = 0.2 * jax.random.normal(k1, (Cin, 3, 3), dtype=jnp.float32)
    dw_b = 0.1 * jax.random.normal(k2, (Cin,), dtype=jnp.float32)
    pw_w = 0.2 * jax.random.normal(k3, (Cout, Cin), dtype=jnp.float32)
    pw_b = 0.1 * jax.random.normal(k4, (Cout,), dtype=jnp.float32)
    gamma = 1.0 + 0.1 * jax.random.normal(k5, (Cout,), dtype=jnp.float32)
    beta = 0.1 * jax.random.normal(k6, (Cout,), dtype=jnp.float32)
    mean = 0.05 * jnp.arange(Cout, dtype=jnp.float32)
    var = 1.0 + 0.03 * jnp.arange(Cout, dtype=jnp.float32)
    bn = (gamma, beta, mean, var, 1e-5)

    # default block: norm=False, activation=False
    out_plain = jax.block_until_ready(
        adaptive_sparse_conv_block(x, dw_w, dw_b, pw_w, pw_b))
    ref_plain = jax.block_until_ready(
        _ref_block(x, dw_w, dw_b, pw_w, pw_b))
    assert out_plain.shape == (B, Cout, H, W), out_plain.shape
    assert jnp.allclose(out_plain, ref_plain, rtol=1e-3, atol=1e-3), \
        float(jnp.max(jnp.abs(out_plain - ref_plain)))

    # block with eval-mode BatchNorm + ReLU fused in
    out_full = jax.block_until_ready(
        adaptive_sparse_conv_block(x, dw_w, dw_b, pw_w, pw_b,
                                   bn_params=bn, activation=True))
    ref_full = jax.block_until_ready(
        _ref_block(x, dw_w, dw_b, pw_w, pw_b, bn_params=bn, activation=True))
    assert jnp.allclose(out_full, ref_full, rtol=1e-3, atol=1e-3), \
        float(jnp.max(jnp.abs(out_full - ref_full)))

    print("KERNEL_OK")
</pallas_src>

<mosaic_0001>
module attributes {stable_mosaic.version = 11 : i64} {
  func.func @kernel(%arg0: i32, %arg1: memref<1x16x256xf32, #tpu.memory_space<vmem>>, %arg2: memref<16x9xf32, #tpu.memory_space<vmem>>, %arg3: memref<16x1xf32, #tpu.memory_space<vmem>>, %arg4: memref<32x16xf32, #tpu.memory_space<vmem>>, %arg5: memref<32x1xf32, #tpu.memory_space<vmem>>, %arg6: memref<9x256xf32, #tpu.memory_space<vmem>>, %arg7: memref<1x32x256xf32, #tpu.memory_space<vmem>>) attributes {dimension_semantics = [#tpu.dimension_semantics<parallel>], iteration_bounds = array<i64: 2>, scalar_prefetch = 0 : i64, scratch_operands = 0 : i64, tpu.core_type = #tpu.core_type<tc>, window_params = [{transform_indices = @transform_0, window_bounds = array<i64: 1, 16, 256>}, {pipeline_mode = #tpu.pipeline_mode<synchronous>, transform_indices = @transform_1, window_bounds = array<i64: 16, 9>}, {pipeline_mode = #tpu.pipeline_mode<synchronous>, transform_indices = @transform_2, window_bounds = array<i64: 16, 1>}, {pipeline_mode = #tpu.pipeline_mode<synchronous>, transform_indices = @transform_3, window_bounds = array<i64: 32, 16>}, {pipeline_mode = #tpu.pipeline_mode<synchronous>, transform_indices = @transform_4, window_bounds = array<i64: 32, 1>}, {pipeline_mode = #tpu.pipeline_mode<synchronous>, transform_indices = @transform_5, window_bounds = array<i64: 9, 256>}, {transform_indices = @transform_6, window_bounds = array<i64: 1, 32, 256>}]} {
    %c0 = arith.constant 0 : index
    %c0_0 = arith.constant 0 : index
    %c0_1 = arith.constant 0 : index
    %0 = vector.load %arg1[%c0, %c0_0, %c0_1] : memref<1x16x256xf32, #tpu.memory_space<vmem>>, vector<1x16x256xf32>
    %1 = vector.shape_cast %0 : vector<1x16x256xf32> to vector<16x256xf32>
    %2 = math.absf %1 : vector<16x256xf32>
    %cst = arith.constant 1.000000e-01 : f32
    %3 = vector.broadcast %cst : f32 to vector<16x256xf32>
    %4 = arith.cmpf ogt, %2, %3 : vector<16x256xf32>
    %cst_2 = arith.constant 0.000000e+00 : f32
    %5 = vector.broadcast %cst_2 : f32 to vector<16x256xf32>
    %6 = arith.select %4, %1, %5 : vector<16x256xi1>, vector<16x256xf32>
    %c0_3 = arith.constant 0 : index
    %c0_4 = arith.constant 0 : index
    %7 = vector.load %arg2[%c0_3, %c0_4] : memref<16x9xf32, #tpu.memory_space<vmem>>, vector<16x9xf32>
    %c0_5 = arith.constant 0 : index
    %c0_6 = arith.constant 0 : index
    %8 = vector.load %arg6[%c0_5, %c0_6] : memref<9x256xf32, #tpu.memory_space<vmem>>, vector<9x256xf32>
    %cst_7 = arith.constant 0.000000e+00 : f32
    %9 = vector.broadcast %cst_7 : f32 to vector<16x256xf32>
    %c17_i32 = arith.constant 17 : i32
    %10 = tpu.dynamic_rotate %6 by %c17_i32 dim 1 : vector<16x256xf32>, i32 -> vector<16x256xf32>
    %11 = vector.extract_strided_slice %7 {offsets = [0, 0], sizes = [16, 1], strides = [1, 1]} : vector<16x9xf32> to vector<16x1xf32>
    %12 = vector.extract_strided_slice %8 {offsets = [0, 0], sizes = [1, 256], strides = [1, 1]} : vector<9x256xf32> to vector<1x256xf32>
    %13 = vector.broadcast %12 : vector<1x256xf32> to vector<16x256xf32>
    %14 = arith.mulf %10, %13 : vector<16x256xf32>
    %15 = vector.broadcast %11 : vector<16x1xf32> to vector<16x256xf32>
    %16 = arith.mulf %14, %15 : vector<16x256xf32>
    %17 = arith.addf %9, %16 : vector<16x256xf32>
    %c16_i32 = arith.constant 16 : i32
    %18 = tpu.dynamic_rotate %6 by %c16_i32 dim 1 : vector<16x256xf32>, i32 -> vector<16x256xf32>
    %19 = vector.extract_strided_slice %7 {offsets = [0, 1], sizes = [16, 1], strides = [1, 1]} : vector<16x9xf32> to vector<16x1xf32>
    %20 = vector.extract_strided_slice %8 {offsets = [1, 0], sizes = [1, 256], strides = [1, 1]} : vector<9x256xf32> to vector<1x256xf32>
    %21 = vector.broadcast %20 : vector<1x256xf32> to vector<16x256xf32>
    %22 = arith.mulf %18, %21 : vector<16x256xf32>
    %23 = vector.broadcast %19 : vector<16x1xf32> to vector<16x256xf32>
    %24 = arith.mulf %22, %23 : vector<16x256xf32>
    %25 = arith.addf %17, %24 : vector<16x256xf32>
    %c15_i32 = arith.constant 15 : i32
    %26 = tpu.dynamic_rotate %6 by %c15_i32 dim 1 : vector<16x256xf32>, i32 -> vector<16x256xf32>
    %27 = vector.extract_strided_slice %7 {offsets = [0, 2], sizes = [16, 1], strides = [1, 1]} : vector<16x9xf32> to vector<16x1xf32>
    %28 = vector.extract_strided_slice %8 {offsets = [2, 0], sizes = [1, 256], strides = [1, 1]} : vector<9x256xf32> to vector<1x256xf32>
    %29 = vector.broadcast %28 : vector<1x256xf32> to vector<16x256xf32>
    %30 = arith.mulf %26, %29 : vector<16x256xf32>
    %31 = vector.broadcast %27 : vector<16x1xf32> to vector<16x256xf32>
    %32 = arith.mulf %30, %31 : vector<16x256xf32>
    %33 = arith.addf %25, %32 : vector<16x256xf32>
    %c1_i32 = arith.constant 1 : i32
    %34 = tpu.dynamic_rotate %6 by %c1_i32 dim 1 : vector<16x256xf32>, i32 -> vector<16x256xf32>
    %35 = vector.extract_strided_slice %7 {offsets = [0, 3], sizes = [16, 1], strides = [1, 1]} : vector<16x9xf32> to vector<16x1xf32>
    %36 = vector.extract_strided_slice %8 {offsets = [3, 0], sizes = [1, 256], strides = [1, 1]} : vector<9x256xf32> to vector<1x256xf32>
    %37 = vector.broadcast %36 : vector<1x256xf32> to vector<16x256xf32>
    %38 = arith.mulf %34, %37 : vector<16x256xf32>
    %39 = vector.broadcast %35 : vector<16x1xf32> to vector<16x256xf32>
    %40 = arith.mulf %38, %39 : vector<16x256xf32>
    %41 = arith.addf %33, %40 : vector<16x256xf32>
    %42 = vector.extract_strided_slice %7 {offsets = [0, 4], sizes = [16, 1], strides = [1, 1]} : vector<16x9xf32> to vector<16x1xf32>
    %43 = vector.extract_strided_slice %8 {offsets = [4, 0], sizes = [1, 256], strides = [1, 1]} : vector<9x256xf32> to vector<1x256xf32>
    %44 = vector.broadcast %43 : vector<1x256xf32> to vector<16x256xf32>
    %45 = arith.mulf %6, %44 : vector<16x256xf32>
    %46 = vector.broadcast %42 : vector<16x1xf32> to vector<16x256xf32>
    %47 = arith.mulf %45, %46 : vector<16x256xf32>
    %48 = arith.addf %41, %47 : vector<16x256xf32>
    %c255_i32 = arith.constant 255 : i32
    %49 = tpu.dynamic_rotate %6 by %c255_i32 dim 1 : vector<16x256xf32>, i32 -> vector<16x256xf32>
    %50 = vector.extract_strided_slice %7 {offsets = [0, 5], sizes = [16, 1], strides = [1, 1]} : vector<16x9xf32> to vector<16x1xf32>
    %51 = vector.extract_strided_slice %8 {offsets = [5, 0], sizes = [1, 256], strides = [1, 1]} : vector<9x256xf32> to vector<1x256xf32>
    %52 = vector.broadcast %51 : vector<1x256xf32> to vector<16x256xf32>
    %53 = arith.mulf %49, %52 : vector<16x256xf32>
    %54 = vector.broadcast %50 : vector<16x1xf32> to vector<16x256xf32>
    %55 = arith.mulf %53, %54 : vector<16x256xf32>
    %56 = arith.addf %48, %55 : vector<16x256xf32>
    %c241_i32 = arith.constant 241 : i32
    %57 = tpu.dynamic_rotate %6 by %c241_i32 dim 1 : vector<16x256xf32>, i32 -> vector<16x256xf32>
    %58 = vector.extract_strided_slice %7 {offsets = [0, 6], sizes = [16, 1], strides = [1, 1]} : vector<16x9xf32> to vector<16x1xf32>
    %59 = vector.extract_strided_slice %8 {offsets = [6, 0], sizes = [1, 256], strides = [1, 1]} : vector<9x256xf32> to vector<1x256xf32>
    %60 = vector.broadcast %59 : vector<1x256xf32> to vector<16x256xf32>
    %61 = arith.mulf %57, %60 : vector<16x256xf32>
    %62 = vector.broadcast %58 : vector<16x1xf32> to vector<16x256xf32>
    %63 = arith.mulf %61, %62 : vector<16x256xf32>
    %64 = arith.addf %56, %63 : vector<16x256xf32>
    %c240_i32 = arith.constant 240 : i32
    %65 = tpu.dynamic_rotate %6 by %c240_i32 dim 1 : vector<16x256xf32>, i32 -> vector<16x256xf32>
    %66 = vector.extract_strided_slice %7 {offsets = [0, 7], sizes = [16, 1], strides = [1, 1]} : vector<16x9xf32> to vector<16x1xf32>
    %67 = vector.extract_strided_slice %8 {offsets = [7, 0], sizes = [1, 256], strides = [1, 1]} : vector<9x256xf32> to vector<1x256xf32>
    %68 = vector.broadcast %67 : vector<1x256xf32> to vector<16x256xf32>
    %69 = arith.mulf %65, %68 : vector<16x256xf32>
    %70 = vector.broadcast %66 : vector<16x1xf32> to vector<16x256xf32>
    %71 = arith.mulf %69, %70 : vector<16x256xf32>
    %72 = arith.addf %64, %71 : vector<16x256xf32>
    %c239_i32 = arith.constant 239 : i32
    %73 = tpu.dynamic_rotate %6 by %c239_i32 dim 1 : vector<16x256xf32>, i32 -> vector<16x256xf32>
    %74 = vector.extract_strided_slice %7 {offsets = [0, 8], sizes = [16, 1], strides = [1, 1]} : vector<16x9xf32> to vector<16x1xf32>
    %75 = vector.extract_strided_slice %8 {offsets = [8, 0], sizes = [1, 256], strides = [1, 1]} : vector<9x256xf32> to vector<1x256xf32>
    %76 = vector.broadcast %75 : vector<1x256xf32> to vector<16x256xf32>
    %77 = arith.mulf %73, %76 : vector<16x256xf32>
    %78 = vector.broadcast %74 : vector<16x1xf32> to vector<16x256xf32>
    %79 = arith.mulf %77, %78 : vector<16x256xf32>
    %80 = arith.addf %72, %79 : vector<16x256xf32>
    %c0_8 = arith.constant 0 : index
    %c0_9 = arith.constant 0 : index
    %81 = vector.load %arg3[%c0_8, %c0_9] : memref<16x1xf32, #tpu.memory_space<vmem>>, vector<16x1xf32>
    %82 = vector.broadcast %81 : vector<16x1xf32> to vector<16x256xf32>
    %83 = arith.addf %80, %82 : vector<16x256xf32>
    %c0_10 = arith.constant 0 : index
    %c0_11 = arith.constant 0 : index
    %84 = vector.load %arg4[%c0_10, %c0_11] : memref<32x16xf32, #tpu.memory_space<vmem>>, vector<32x16xf32>
    %cst_12 = arith.constant dense<0.000000e+00> : vector<32x256xf32>
    %85 = tpu.matmul %84, %83, %cst_12 {dimension_numbers = #tpu.dot_dimension_numbers<[1], [0], [0], [1], [0, 0, 1, 1], [], []>} : vector<32x16xf32>, vector<16x256xf32>, vector<32x256xf32> -> vector<32x256xf32>
    %c0_13 = arith.constant 0 : index
    %c0_14 = arith.constant 0 : index
    %86 = vector.load %arg5[%c0_13, %c0_14] : memref<32x1xf32, #tpu.memory_space<vmem>>, vector<32x1xf32>
    %87 = vector.broadcast %86 : vector<32x1xf32> to vector<32x256xf32>
    %88 = arith.addf %85, %87 : vector<32x256xf32>
    %c0_15 = arith.constant 0 : index
    %c0_16 = arith.constant 0 : index
    %c0_17 = arith.constant 0 : index
    %89 = vector.load %arg7[%c0_15, %c0_16, %c0_17] : memref<1x32x256xf32, #tpu.memory_space<vmem>>, vector<1x32x256xf32>
    %90 = vector.shape_cast %89 : vector<1x32x256xf32> to vector<32x256xf32>
    %91 = vector.shape_cast %88 : vector<32x256xf32> to vector<1x32x256xf32>
    tpu.vector_store %arg7[%c0_15, %c0_16, %c0_17], %91 {strides = array<i32>} : memref<1x32x256xf32, #tpu.memory_space<vmem>>, vector<1x32x256xf32>,
    return
  }
  func.func @transform_0(%arg0: i32) -> (i32, i32, i32) {
    %c0_i32 = arith.constant 0 : i32
    %c0_i32_0 = arith.constant 0 : i32
    %c0_i32_1 = arith.constant 0 : i32
    return %arg0, %c0_i32, %c0_i32_0 : i32, i32, i32
  }
  func.func @transform_1(%arg0: i32) -> (i32, i32) {
    %c0_i32 = arith.constant 0 : i32
    %c0_i32_0 = arith.constant 0 : i32
    %c0_i32_1 = arith.constant 0 : i32
    return %c0_i32, %c0_i32_0 : i32, i32
  }
  func.func @transform_2(%arg0: i32) -> (i32, i32) {
    %c0_i32 = arith.constant 0 : i32
    %c0_i32_0 = arith.constant 0 : i32
    %c0_i32_1 = arith.constant 0 : i32
    return %c0_i32, %c0_i32_0 : i32, i32
  }
  func.func @transform_3(%arg0: i32) -> (i32, i32) {
    %c0_i32 = arith.constant 0 : i32
    %c0_i32_0 = arith.constant 0 : i32
    %c0_i32_1 = arith.constant 0 : i32
    return %c0_i32, %c0_i32_0 : i32, i32
  }
  func.func @transform_4(%arg0: i32) -> (i32, i32) {
    %c0_i32 = arith.constant 0 : i32
    %c0_i32_0 = arith.constant 0 : i32
    %c0_i32_1 = arith.constant 0 : i32
    return %c0_i32, %c0_i32_0 : i32, i32
  }
  func.func @transform_5(%arg0: i32) -> (i32, i32) {
    %c0_i32 = arith.constant 0 : i32
    %c0_i32_0 = arith.constant 0 : i32
    %c0_i32_1 = arith.constant 0 : i32
    return %c0_i32, %c0_i32_0 : i32, i32
  }
  func.func @transform_6(%arg0: i32) -> (i32, i32, i32) {
    %c0_i32 = arith.constant 0 : i32
    %c0_i32_0 = arith.constant 0 : i32
    %c0_i32_1 = arith.constant 0 : i32
    return %arg0, %c0_i32, %c0_i32_0 : i32, i32, i32
  }
}

</mosaic_0001>

<bundles_post_ra>
// kernel: tpu_custom_call.1
= control target key start
LH: loop header
LB: loop body
LE: loop exit
PB: predicated region body
PF: predicated region fallthrough
CT: control target
= control target key end

     0   :  { %11 = vsyncpa [#allocation3], 0  ;;  %s1574_s0 = inlined_call_operand.vmem [shape: f32[2,16,256], index: 0, kind: input, shape index: {}]   ;;  %s1575_s1 = inlined_call_operand.hbm [shape: f32[16,9], index: 1, kind: input, shape index: {}]   ;;  %s1576_s2 = inlined_call_operand.vmem [shape: f32[16,1], index: 2, kind: input, shape index: {}]   ;;  %s1577_s3 = inlined_call_operand.vmem [shape: f32[32,16], index: 3, kind: input, shape index: {}]   ;;  %s1578_s4 = inlined_call_operand.vmem [shape: f32[32,1], index: 4, kind: input, shape index: {}]   ;;  %s1579_s5 = inlined_call_operand.vmem [shape: f32[9,256], index: 5, kind: input, shape index: {}]   ;;  %s1580_s6 = inlined_call_operand.hbm [shape: f32[2,32,256], index: 6, kind: output, shape index: {}]  }
   0x1   :  { %12 = vsyncpa [#allocation4], 0 }
   0x2   :  { %14 = vsyncpa [#allocation4 + $0x1], 0  ;;  %s1159_s21 = smov 0   ;;  %s1161_s22 = smov 0  }
   0x3   :  { %s1163_s23 = smov 0   ;;  %s1165_s24 = smov 0  }
   0x4 LB: > { %s1180_s25 = sadd.s32 4294967295, %s1099_s24   ;;  %s889_s26 = sadd.s32 4294967294, %s1099_s24   ;;  %s1099_s24 = sphi %s1165_s24, %s1596_s24   ;;  %s1095_s23 = sphi %s1163_s23, %s1595_s23   ;;  %s1091_s22 = sphi %s1161_s22, %s1594_s22   ;;  %s1087_s21 = sphi %s1159_s21, %s1593_s21  }
   0x5   : > { %s1184_s27 = sadd.s32 1, %s1099_s24   ;;  %s158_s28 = sadd.s32 1, %s1095_s23 }
   0x6   : > { %s155_s29 = ssub.s32 %s1099_s24, %s1184_s27  ;;  %p168_p0 = scmp.ne.s32.totalorder %s1095_s23, %s1091_s22 }
   0x7   : > { %p156_p1 = scmp.eq.s32.totalorder %s155_s29, 0  ;;  %p169_p2 = scmp.eq.s32.totalorder %s1180_s25, 1 }
   0x8   : > { %p174_p3 = scmp.ne.s32.totalorder %s1091_s22, %s1087_s21  ;;  %p175_p4 = scmp.eq.s32.totalorder %s889_s26, 1 }
   0x9   : > { %s1195_s30 = scalar_select %p156_p1, %s1095_s23, %s158_s28  }
   0xa   : > { %p1197_p5 = por %p169_p2, %p168_p0  ;;  %p1201_p6 = por %p175_p4, %p174_p3 }
   0xb   : > { %p890_p7 = scmp.ge.s32.totalorder %s1099_s24, 1  ;;  %p182_p8 = scmp.lt.s32.totalorder %s1099_s24, 3 }
   0xc   : > { %s1584_s7 = scalar_select %p1197_p5, 1, 0 }
   0xd   : > { %s1585_s8 = scalar_select %p1201_p6, 1, 0 }
   0xe   : > { %p1581_p9 = scmp.eq.s32.totalorder %s1180_s25, 0  ;;  %p1208_p10 = pnand %p890_p7, %p182_p8 }
   0xf   : > { %s1101_s10 = smov [#allocation2]   ;;  %s1005_s15 = scalar_lea.hbm %s1575_s1, 256 }
  0x10   : > { %s1586_s9 = scalar_select %p1208_p10, 1, 0 }
  0x11   : > { %s194_s11 = sshll.u32 %s1101_s10, 4  ;;  %p923_p11 = pneg %p1208_p10  ;;  %s195_s11 = int_to_ptr.vmem [resolvable:$true] %s194_s11 }
  0x12   : > { %p1006_p13 = scmp.ne.s32.totalorder %s1575_s1, %s1005_s15  ;;  %p1012_p3 = scmp.lt.u32.totalorder %s1005_s15, %s1575_s1 }
  0x13   : > { %p1216_p12 = pnand %p1581_p9, %p923_p11 }
  0x15   : > { %p1007_p0 = pneg %p1216_p12 }
  0x17   : > { %p1008_p1 = pnand %p1007_p0, %p1006_p13 }
  0x19   : > { %p1009_p2 = pneg %p1008_p1 }
  0x1b   : > { %p1014_p4 = pnand %p1012_p3, %p1009_p2 }
  0x1d   : > { %1017 = shalt.err (!%p1014_p4)
}
  0x1e   : > { %s1018_s20 = scalar_lea.vmem %s195_s11, 256  ;;  %p1026_p9 = scmp.lt.s32.totalorder %s195_s11, %s195_s11 }
  0x1f   : > { %p1019_p7 = scmp.ne.s32.totalorder %s195_s11, %s1018_s20  ;;  %p1027_p6 = scmp.lt.s32.totalorder %s1018_s20, %s1018_s20 }
  0x21   : > { %p1021_p8 = pnand %p1019_p7, %p1007_p0  ;;  %p1028_p5 = por %p1027_p6, %p1026_p9 }
  0x23   : > { %p1022_p11 = pneg %p1021_p8 }
  0x25   : > { %p1029_p10 = pnand %p1028_p5, %p1022_p11 }
  0x27   : > { %1032 = shalt.err (!%p1029_p10)
}
  0x28   : > { %s1102_s26 = smov 128   ;;  %s1103_s28 = smov 8  }
  0x29   : > { %926 = dma.hbm_to_vmem [thread:$0]  (!%p1216_p12), %s1575_s1, 256, %s195_s11, [#allocation3], %s1102_s26, %s1102_s26, %s1103_s28  }
  0x2a   : > { %p1588_p13 = scmp.ne.s32.totalorder %s1586_s9, 0 }
  0x2b   : > { %p1589_p1 = scmp.eq.s32.totalorder (!%p1588_p13), %s1180_s25, 0 }
  0x2c   : > { %230 = sbr.rel (%p1588_p13) target bundleno = 541 (0x21d), region = 44 }
  0x33   : > { %1078 = dma.done.wait (%p1589_p1), [#allocation3], 256   ;;  %p1590_p0 = pmov %p1589_p1 }
  0x34   : > { %p260_p5 = scmp.lt.s32.totalorder %s1180_s25, 1  ;;  %v1104_v0 = vmov 1   ;;  %v1105_v1 = vmov 0   ;;  %v1248_v2 = vld [vmem:[#allocation2] sm:$0xff]  ;;  %v1252_v5 = vld [vmem:[#allocation2 + $0x8] sm:$0xff]  ;;  %v1106_v12 = vmov 2   ;;  %v295_v32 = vlaneseq }
  0x35   : > { %1080 = vsyncadd (%p1590_p0), [#allocation3], 4294967040  ;;  %989 = vset.pattern.permute.xlu1 %v1104_v0  ;;  %988 = vset.pattern.permute.xlu0 %v1105_v1  ;;  %s1107_s15 = smov 17   ;;  %v1108_v17 = vmov 3   ;;  %s1109_s16 = smov 16   ;;  %v1111_v18 = vmov 4  }
  0x36   : > { %s261_s12 = scalar_select %p260_p5, %s1180_s25, 1  ;;  %358 = vperm.xlu1 %989, %v1248_v2   ;;  %316 = vperm.xlu0 %988, %v1248_v2   ;;  %v1113_v19 = vmov 5   ;;  %v1115_v20 = vmov 7   ;;  %v1116_v21 = vmov 6   ;;  %v1118_v22 = vmov 8   ;;  %v647_v23 = vld [vmem:[%s1576_s2] sm:$0xff] }
  0x37   : > { %s1110_s17 = smov 15   ;;  %s1112_s18 = smov 1   ;;  %v668_v24 = vld [vmem:[%s1578_s4 + $0x8] sm:$0xff]  ;;  %v670_v25 = vld [vmem:[%s1578_s4 + $0x18] sm:$0xff]  ;;  %v667_v27 = vld [vmem:[%s1578_s4] sm:$0xff]  ;;  %v1121_v29 = vmov 0.0  }
  0x38   : > { %s909_s13 = sshll.u32 %s261_s12, 5  ;;  %s1114_s19 = smov 127   ;;  %v648_v26 = vld [vmem:[%s1576_s2 + $0x8] sm:$0xff]  ;;  %v669_v28 = vld [vmem:[%s1578_s4 + $0x10] sm:$0xff]  ;;  %768 = vmatprep.mubr.f32.mxu0 %v1121_v29  ;;  %780 = vmatprep.mubr.f32.mxu1 %v1121_v29  ;;  %v1336_v35 = vshrl.u32 %v295_v32, 7  ;;  %v1340_v38 = vand.u32 127, %v295_v32 }
  0x39   : > { %s264_s9 = scalar_lea.vmem %s1574_s0, %s909_s13  ;;  %s1117_s20 = smov 113   ;;  %v1346_v40 = vld [vmem:[%s1579_s5] sm:$0xff]  ;;  %v1351_v41 = vld [vmem:[%s1579_s5 + $0x8] sm:$0xff]  ;;  %vm691_vm12 = vcmask 130048  }
  0x3a   : > { %v267_v3 = vld [vmem:[%s264_s9 + $0x10] sm:$0xff]  ;;  %v265_v4 = vld [vmem:[%s264_s9] sm:$0xff]  ;;  %v268_v8 = vld [vmem:[%s264_s9 + $0x18] sm:$0xff]  ;;  %362 = vperm.xlu1 %989, %v1252_v5   ;;  %321 = vperm.xlu0 %988, %v1252_v5   ;;  %s1119_s26 = smov 112   ;;  %s1120_s28 = smov 111   ;;  %v304_v39 = vsub.s32 0, %v1336_v35 }
  0x3b   : > { %v271_v6 = vand.u32 2147483647, %v267_v3  ;;  %v269_v7 = vand.u32 2147483647, %v265_v4  ;;  %v266_v9 = vld [vmem:[%s264_s9 + $0x8] sm:$0xff]  ;;  %vm297_vm4 = vcmp.lt.s32.totalorder %v1340_v38, 17 }
  0x3c   : > { %v272_v10 = vand.u32 2147483647, %v268_v8  ;;  %v270_v11 = vand.u32 2147483647, %v266_v9  ;;  %v305_v44 = vrot.slane %v1346_v40, %v304_v39  ;;  %v309_v45 = vrot.slane %v1351_v41, %v304_v39  ;;  %s257_s29 = sand.u32 1, %s1091_s22   ;;  %s910_s11 = sshll.u32 %s1180_s25, 10 }
  0x3d   : > { %vm275_vm0 = vcmp.gt.f32.partialorder %v271_v6, 0.1  ;;  %vm273_vm1 = vcmp.gt.f32.partialorder %v269_v7, 0.1  ;;  %v347_v52 = vsub.s32 1, %v1336_v35  ;;  %vm340_vm5 = vcmp.lt.s32.totalorder %v1340_v38, 16  ;;  %s1528_s25 = scalar_lea.hbm %s1580_s6, %s910_s11 }
  0x3e   : > { %991 = vset.pattern.permute.xlu1 %v1106_v12  ;;  %990 = vset.pattern.permute.xlu0 %v1106_v12  ;;  %v1258_v13 = vsel %vm275_vm0, %v267_v3, 0.0  ;;  %v1260_v14 = vsel %vm273_vm1, %v265_v4, 0.0  ;;  %vm276_vm2 = vcmp.gt.f32.partialorder %v272_v10, 0.1  ;;  %vm274_vm3 = vcmp.gt.f32.partialorder %v270_v11, 0.1 }
  0x3f   : > { %403 = vperm.xlu1 %991, %v1252_v5   ;;  %399 = vperm.xlu0 %990, %v1248_v2   ;;  %v1264_v15 = vsel %vm276_vm2, %v268_v8, 0.0  ;;  %v1266_v16 = vsel %vm274_vm3, %v266_v9, 0.0  ;;  %v348_v59 = vrot.slane %v1346_v40, %v347_v52  ;;  %v352_v60 = vrot.slane %v1351_v41, %v347_v52  ;;  %s895_s10 = sshll.u32 %s257_s29, 6  ;;  %p1591_p9 = scmp.ne.s32.totalorder %s1584_s7, 0 }
  0x40   : > { %vm381_vm6 = vcmp.lt.s32.totalorder %v1340_v38, 15  ;;  %vm422_vm7 = vcmp.lt.s32.totalorder %v1340_v38, 1  ;;  %vm491_vm8 = vcmp.lt.s32.totalorder %v1340_v38, 127  ;;  %vm532_vm9 = vcmp.lt.s32.totalorder %v1340_v38, 113  ;;  %s259_s12 = scalar_lea.vmem [#allocation5], %s895_s10 }
  0x41   : > { %vm614_vm10 = vcmp.lt.s32.totalorder %v1340_v38, 111  ;;  %vm573_vm11 = vcmp.lt.s32.totalorder %v1340_v38, 112  ;;  %s815_s13 = sshll.u32 %s259_s12, 4  ;;  %s1523_s13 = int_to_ptr.vmem [resolvable:$true] %s815_s13 }
  0x43   : > { %289 = vrot.lane.b32.xlu0 %v1258_v13, %s1107_s15  ;;  %287 = vrot.lane.b32.xlu1 %v1260_v14, %s1107_s15 }
  0x44   : > { %992 = vset.pattern.permute.xlu1 %v1108_v17  ;;  %993 = vset.pattern.permute.xlu0 %v1108_v17 }
  0x47   : > { %293 = vrot.lane.b32.xlu0 %v1264_v15, %s1107_s15  ;;  %291 = vrot.lane.b32.xlu1 %v1266_v16, %s1107_s15  ;;  %s1532_s15 = scalar_lea.sflag [#allocation4], %s257_s29 }
  0x4b   : > { %334 = vrot.lane.b32.xlu0 %v1258_v13, %s1109_s16  ;;  %332 = vrot.lane.b32.xlu1 %v1260_v14, %s1109_s16 }
  0x4f   : > { %338 = vrot.lane.b32.xlu0 %v1264_v15, %s1109_s16  ;;  %336 = vrot.lane.b32.xlu1 %v1266_v16, %s1109_s16 }
  0x53   : > { %444 = vperm.xlu0 %993, %v1252_v5   ;;  %440 = vperm.xlu1 %992, %v1248_v2  }
  0x57   : > { %377 = vrot.lane.b32.xlu0 %v1266_v16, %s1110_s17  ;;  %373 = vrot.lane.b32.xlu1 %v1260_v14, %s1110_s17 }
  0x58   : > { %994 = vset.pattern.permute.xlu0 %v1111_v18  ;;  %995 = vset.pattern.permute.xlu1 %v1111_v18 }
  0x5b   : > { %468 = vperm.xlu0 %994, %v1248_v2   ;;  %375 = vrot.lane.b32.xlu1 %v1258_v13, %s1110_s17 }
  0x5f   : > { %416 = vrot.lane.b32.xlu0 %v1258_v13, %s1112_s18  ;;  %379 = vrot.lane.b32.xlu1 %v1264_v15, %s1110_s17  ;;  %s1033_s17 = scalar_lea.vmem %s1523_s13, 1024 }
  0x60   : > { %997 = vset.pattern.permute.xlu0 %v1113_v19  ;;  %p1034_p6 = scmp.ne.s32.totalorder %s1523_s13, %s1033_s17 }
  0x62   : > { %p1035_p10 = pnand %p1034_p6, %p1591_p9 }
  0x63   : > { %420 = vrot.lane.b32.xlu0 %v1264_v15, %s1112_s18  ;;  %472 = vperm.xlu1 %995, %v1252_v5  }
  0x64   : > { %p1036_p12 = pneg %p1035_p10 }
  0x67   : > { %513 = vperm.xlu0 %997, %v1252_v5   ;;  %414 = vrot.lane.b32.xlu1 %v1260_v14, %s1112_s18 }
  0x68   : > { %996 = vset.pattern.permute.xlu1 %v1113_v19 }
  0x6b   : > { %483 = vrot.lane.b32.xlu0 %v1260_v14, %s1114_s19  ;;  %418 = vrot.lane.b32.xlu1 %v1266_v16, %s1112_s18  ;;  %s1122_s18 = smov [#allocation5]  }
  0x6c   : > { %999 = vset.pattern.permute.xlu0 %v1115_v20 }
  0x6f   : > { %487 = vrot.lane.b32.xlu0 %v1266_v16, %s1114_s19  ;;  %509 = vperm.xlu1 %996, %v1248_v2  }
  0x73   : > { %591 = vperm.xlu0 %999, %v1248_v2   ;;  %998 = vset.pattern.permute.xlu1 %v1116_v21 }
  0x74   : > { %550 = vperm.xlu1 %998, %v1248_v2  }
  0x77   : > { %526 = vrot.lane.b32.xlu0 %v1258_v13, %s1117_s20 }
  0x78   : > { %554 = vperm.xlu1 %998, %v1252_v5   ;;  %1002 = vset.pattern.permute.xlu0 %v1118_v22 }
  0x7b   : > { %530 = vrot.lane.b32.xlu0 %v1264_v15, %s1117_s20 }
  0x7c   : > { %485 = vrot.lane.b32.xlu1 %v1258_v13, %s1114_s19 }
  0x7d   : > { %1000 = vset.pattern.permute.xlu1 %v1115_v20 }
  0x7f   : > { %636 = vperm.xlu0 %1002, %v1252_v5  }
  0x80   : > { %489 = vrot.lane.b32.xlu1 %v1264_v15, %s1114_s19  ;;  %s1037_s19 = sshll.u32 %s1122_s18, 4  ;;  %s1038_s19 = int_to_ptr.vmem [resolvable:$false] %s1037_s19 }
  0x81   : > { %p1040_p2 = scmp.lt.s32.totalorder %s1523_s13, %s1038_s19 }
  0x83   : > { %569 = vrot.lane.b32.xlu0 %v1266_v16, %s1119_s26 }
  0x84   : > { %595 = vperm.xlu1 %1000, %v1252_v5   ;;  %1003 = vset.pattern.permute.xlu0 %v1105_v1 }
  0x87   : > { %606 = vrot.lane.b32.xlu0 %v1260_v14, %s1120_s28 }
  0x88   : > { %524 = vrot.lane.b32.xlu1 %v1260_v14, %s1117_s20 }
  0x89   : > { %1001 = vset.pattern.permute.xlu1 %v1118_v22 }
  0x8b   : > { %610 = vrot.lane.b32.xlu0 %v1266_v16, %s1120_s28 }
  0x8c   : > { %528 = vrot.lane.b32.xlu1 %v1266_v16, %s1117_s20  ;;  %s1039_s20 = scalar_lea.vmem %s1038_s19, 2048 }
  0x8d   : > { %p1041_p3 = scmp.lt.s32.totalorder %s1039_s20, %s1033_s17 }
  0x8f   : > { %651 = vperm.xlu0 %1003, %v647_v23   ;;  %p1042_p4 = por %p1041_p3, %p1040_p2 }
  0x90   : > { %632 = vperm.xlu1 %1001, %v1248_v2  }
  0x91   : > { %p1043_p7 = pnand %p1042_p4, %p1036_p12 }
  0x93   : > { %678 = vperm.xlu0 %1003, %v668_v24  }
  0x94   : > { %565 = vrot.lane.b32.xlu1 %v1260_v14, %s1119_s26 }
  0x95   : > { %1004 = vset.pattern.permute.xlu1 %v1105_v1  ;;  %v388_v1 = vsub.s32 2, %v1336_v35 }
  0x97   : > { %688 = vperm.xlu0 %1003, %v670_v25   ;;  %v389_v22 = vrot.slane %v1346_v40, %v388_v1  ;;  %v393_v23 = vrot.slane %v1351_v41, %v388_v1 }
  0x98   : > { %567 = vrot.lane.b32.xlu1 %v1258_v13, %s1119_s26 }
  0x9c   : > { %571 = vrot.lane.b32.xlu1 %v1264_v15, %s1119_s26 }
  0xa0   : > { %608 = vrot.lane.b32.xlu1 %v1258_v13, %s1120_s28 }
  0xa4   : > { %612 = vrot.lane.b32.xlu1 %v1264_v15, %s1120_s28 }
  0xa8   : > { %656 = vperm.xlu1 %1004, %v648_v26  }
  0xac   : > { %673 = vperm.xlu1 %1004, %v667_v27  }
  0xb0   : > { %683 = vperm.xlu1 %1004, %v669_v28  }
  0xb5   : > { %v359_v30 = vpop.permute.xlu1 %358  ;;  %v317_v31 = vpop.permute.xlu0 %316 }
  0xb9   : > { %v363_v33 = vpop.permute.xlu1 %362  ;;  %v322_v34 = vpop.permute.xlu0 %321 }
  0xbe   : > { %v1338_v36 = vpop.permute.xlu1 %403  ;;  %v400_v37 = vpop.permute.xlu0 %399 }
  0xc2   : > { %v290_v42 = vpop.permute.xlu0 %289  ;;  %v288_v43 = vpop.permute.xlu1 %287 }
  0xc6   : > { %v294_v46 = vpop.permute.xlu0 %293  ;;  %v292_v47 = vpop.permute.xlu1 %291 }
  0xc7   : > { %v298_v48 = vsel %vm297_vm4, %v288_v43, %v292_v47  ;;  %v300_v49 = vsel %vm297_vm4, %v292_v47, %v288_v43  ;;  %v299_v53 = vsel %vm297_vm4, %v290_v42, %v294_v46  ;;  %v301_v54 = vsel %vm297_vm4, %v294_v46, %v290_v42 }
  0xc8   : > { %v310_v50 = vmul.f32 %v305_v44, %v300_v49  ;;  %v311_v51 = vmul.f32 %v309_v45, %v298_v48  ;;  %v312_v61 = vmul.f32 %v305_v44, %v301_v54  ;;  %v313_v62 = vmul.f32 %v309_v45, %v299_v53 }
  0xca   : > { %v324_v55 = vmul.f32 %v317_v31, %v310_v50  ;;  %v325_v56 = vmul.f32 %v317_v31, %v311_v51  ;;  %v335_v57 = vpop.permute.xlu0 %334  ;;  %v333_v58 = vpop.permute.xlu1 %332  ;;  %v326_v10 = vmul.f32 %v322_v34, %v312_v61  ;;  %v327_v11 = vmul.f32 %v322_v34, %v313_v62 }
  0xce   : > { %v339_v63 = vpop.permute.xlu0 %338  ;;  %v337_v0 = vpop.permute.xlu1 %336 }
  0xcf   : > { %v342_v2 = vsel %vm340_vm5, %v335_v57, %v339_v63  ;;  %v344_v3 = vsel %vm340_vm5, %v339_v63, %v335_v57  ;;  %v341_v4 = vsel %vm340_vm5, %v333_v58, %v337_v0  ;;  %v343_v5 = vsel %vm340_vm5, %v337_v0, %v333_v58 }
  0xd0   : > { %v355_v6 = vmul.f32 %v348_v59, %v344_v3  ;;  %v356_v7 = vmul.f32 %v352_v60, %v342_v2  ;;  %v353_v8 = vmul.f32 %v348_v59, %v343_v5  ;;  %v354_v9 = vmul.f32 %v352_v60, %v341_v4 }
  0xd1   : > { %v429_v58 = vsub.s32 3, %v1336_v35 }
  0xd2   : > { %v367_v12 = vmul.f32 %v363_v33, %v355_v6  ;;  %v368_v17 = vmul.f32 %v363_v33, %v356_v7  ;;  %v365_v18 = vmul.f32 %v359_v30, %v353_v8  ;;  %v366_v19 = vmul.f32 %v359_v30, %v354_v9  ;;  %v1361_v20 = vpop.permute.xlu0 %444  ;;  %v441_v21 = vpop.permute.xlu1 %440 }
  0xd3   : > { %v430_v61 = vrot.slane %v1346_v40, %v429_v58  ;;  %v434_v62 = vrot.slane %v1351_v41, %v429_v58 }
  0xd4   : > { %v371_v24 = vadd.f32 %v367_v12, %v326_v10  ;;  %v372_v25 = vadd.f32 %v368_v17, %v327_v11  ;;  %v369_v26 = vadd.f32 %v365_v18, %v324_v55  ;;  %v370_v27 = vadd.f32 %v366_v19, %v325_v56 }
  0xd6   : > { %v378_v28 = vpop.permute.xlu0 %377  ;;  %v374_v31 = vpop.permute.xlu1 %373 }
  0xd7   : > { %v382_v32 = vsel %vm381_vm6, %v374_v31, %v378_v28  ;;  %v384_v30 = vsel %vm381_vm6, %v378_v28, %v374_v31 }
  0xd8   : > { %v394_v33 = vmul.f32 %v389_v22, %v384_v30  ;;  %v395_v34 = vmul.f32 %v393_v23, %v382_v32  ;;  %v498_v30 = vsub.s32 5, %v1336_v35 }
  0xda   : > { %v406_v39 = vmul.f32 %v400_v37, %v394_v33  ;;  %v407_v42 = vmul.f32 %v400_v37, %v395_v34  ;;  %v1370_v43 = vpop.permute.xlu0 %468  ;;  %v376_v44 = vpop.permute.xlu1 %375  ;;  %v539_v33 = vsub.s32 6, %v1336_v35 }
  0xdc   : > { %v410_v45 = vadd.f32 %v406_v39, %v369_v26  ;;  %v411_v46 = vadd.f32 %v407_v42, %v370_v27 }
  0xde   : > { %v417_v47 = vpop.permute.xlu0 %416  ;;  %v380_v48 = vpop.permute.xlu1 %379 }
  0xdf   : > { %v383_v49 = vsel %vm381_vm6, %v376_v44, %v380_v48  ;;  %v385_v50 = vsel %vm381_vm6, %v380_v48, %v376_v44 }
  0xe0   : > { %v396_v51 = vmul.f32 %v389_v22, %v385_v50  ;;  %v397_v52 = vmul.f32 %v393_v23, %v383_v49  ;;  %v499_v50 = vrot.slane %v1346_v40, %v498_v30 }
  0xe2   : > { %v408_v53 = vmul.f32 %v1338_v36, %v396_v51  ;;  %v409_v54 = vmul.f32 %v1338_v36, %v397_v52  ;;  %v421_v37 = vpop.permute.xlu0 %420  ;;  %v1378_v55 = vpop.permute.xlu1 %472  ;;  %v503_v51 = vrot.slane %v1351_v41, %v498_v30  ;;  %v540_v52 = vrot.slane %v1346_v40, %v539_v33 }
  0xe3   : > { %v424_v27 = vsel %vm422_vm7, %v417_v47, %v421_v37  ;;  %v426_v28 = vsel %vm422_vm7, %v421_v37, %v417_v47 }
  0xe4   : > { %v1380_v56 = vadd.f32 %v408_v53, %v371_v24  ;;  %v1382_v57 = vadd.f32 %v409_v54, %v372_v25  ;;  %v457_v25 = vsub.s32 4, %v1336_v35  ;;  %v437_v39 = vmul.f32 %v430_v61, %v426_v28 }
  0xe5   : > { %v438_v42 = vmul.f32 %v434_v62, %v424_v27 }
  0xe6   : > { %v1385_v59 = vpop.permute.xlu0 %513  ;;  %v415_v60 = vpop.permute.xlu1 %414  ;;  %v458_v31 = vrot.slane %v1346_v40, %v457_v25  ;;  %v462_v32 = vrot.slane %v1351_v41, %v457_v25  ;;  %v449_v53 = vmul.f32 %v1361_v20, %v437_v39 }
  0xe8   : > { %v464_v47 = vmul.f32 %v462_v32, %v1266_v16  ;;  %v465_v48 = vmul.f32 %v458_v31, %v1258_v13  ;;  %v466_v49 = vmul.f32 %v462_v32, %v1264_v15 }
  0xea   : > { %v419_v63 = vpop.permute.xlu1 %418  ;;  %v484_v1 = vpop.permute.xlu0 %483 }
  0xeb   : > { %v423_v36 = vsel %vm422_vm7, %v415_v60, %v419_v63  ;;  %v425_v0 = vsel %vm422_vm7, %v419_v63, %v415_v60 }
  0xec   : > { %v435_v2 = vmul.f32 %v430_v61, %v425_v0  ;;  %v436_v3 = vmul.f32 %v434_v62, %v423_v36 }
  0xee   : > { %v447_v4 = vmul.f32 %v441_v21, %v435_v2  ;;  %v448_v5 = vmul.f32 %v441_v21, %v436_v3  ;;  %v1394_v6 = vpop.permute.xlu1 %509  ;;  %v488_v9 = vpop.permute.xlu0 %487 }
  0xef   : > { %v492_v16 = vsel %vm491_vm8, %v484_v1, %v488_v9  ;;  %v494_v13 = vsel %vm491_vm8, %v488_v9, %v484_v1 }
  0xf0   : > { %v1396_v7 = vadd.f32 %v447_v4, %v410_v45  ;;  %v452_v8 = vadd.f32 %v448_v5, %v411_v46  ;;  %v463_v45 = vmul.f32 %v458_v31, %v1260_v14  ;;  %v580_v46 = vsub.s32 7, %v1336_v35 }
  0xf1   : > { %v544_v14 = vrot.slane %v1351_v41, %v539_v33  ;;  %v450_v35 = vmul.f32 %v1361_v20, %v438_v42  ;;  %v476_v20 = vmul.f32 %v1370_v43, %v464_v47  ;;  %v504_v63 = vmul.f32 %v499_v50, %v492_v16 }
  0xf2   : > { %v1402_v12 = vpop.permute.xlu0 %591  ;;  %v581_v37 = vrot.slane %v1346_v40, %v580_v46  ;;  %v585_v58 = vrot.slane %v1351_v41, %v580_v46  ;;  %v475_v60 = vmul.f32 %v1370_v43, %v463_v45  ;;  %v505_v36 = vmul.f32 %v503_v51, %v494_v13  ;;  %v898_v46 = vld [vmem:[%s1579_s5 + $0x10] ss:$0 sm:$0xff] }
  0xf3   : > { %v1398_v10 = vpop.permute.xlu1 %550  ;;  %v453_v41 = vadd.f32 %v449_v53, %v1380_v56  ;;  %v454_v1 = vadd.f32 %v450_v35, %v1382_v57  ;;  %v477_v4 = vmul.f32 %v1378_v55, %v465_v48  ;;  %v478_v5 = vmul.f32 %v1378_v55, %v466_v49 }
  0xf4   : > { %v480_v25 = vadd.f32 %v476_v20, %v452_v8  ;;  %v516_v57 = vmul.f32 %v1394_v6, %v504_v63 }
  0xf5   : > { %v481_v32 = vadd.f32 %v477_v4, %v453_v41  ;;  %v482_v30 = vadd.f32 %v478_v5, %v454_v1 }
  0xf6   : > { %v1404_v18 = vpop.permute.xlu0 %526 }
  0xf7   : > { %v1400_v11 = vpop.permute.xlu1 %554 }
  0xfa   : > { %v1408_v23 = vpop.permute.xlu0 %530 }
  0xfb   : > { %v486_v17 = vpop.permute.xlu1 %485  ;;  %v534_v55 = vsel %vm532_vm9, %v1404_v18, %v1408_v23 }
  0xfe   : > { %v1410_v24 = vpop.permute.xlu0 %636 }
  0xff   : > { %v490_v19 = vpop.permute.xlu1 %489 }
 0x100   : > { %v493_v0 = vsel %vm491_vm8, %v486_v17, %v490_v19  ;;  %v495_v40 = vsel %vm491_vm8, %v490_v19, %v486_v17  ;;  %v479_v17 = vadd.f32 %v475_v60, %v1396_v7  ;;  %v536_v7 = vsel %vm532_vm9, %v1408_v23, %v1404_v18  ;;  %v899_v18 = vld [vmem:[%s1579_s5 + $0x18] ss:$0 sm:$0xff] }
 0x101   : > { %v506_v19 = vmul.f32 %v499_v50, %v493_v0  ;;  %v507_v56 = vmul.f32 %v503_v51, %v495_v40  ;;  %v547_v50 = vmul.f32 %v540_v52, %v534_v55  ;;  %v548_v51 = vmul.f32 %v544_v14, %v536_v7 }
 0x102   : > { %v570_v34 = vpop.permute.xlu0 %569  ;;  %v520_v47 = vadd.f32 %v516_v57, %v479_v17 }
 0x103   : > { %v1406_v22 = vpop.permute.xlu1 %595  ;;  %v518_v42 = vmul.f32 %v1385_v59, %v506_v19  ;;  %v519_v45 = vmul.f32 %v1385_v59, %v507_v56  ;;  %v560_v0 = vmul.f32 %v1400_v11, %v548_v51 }
 0x106   : > { %v607_v54 = vpop.permute.xlu0 %606 }
 0x107   : > { %v525_v21 = vpop.permute.xlu1 %524 }
 0x10a   : > { %v611_v27 = vpop.permute.xlu0 %610 }
 0x10b   : > { %v529_v26 = vpop.permute.xlu1 %528  ;;  %v617_v23 = vsel %vm614_vm10, %v611_v27, %v607_v54 }
 0x10c   : > { %v533_v61 = vsel %vm532_vm9, %v525_v21, %v529_v26  ;;  %v535_v62 = vsel %vm532_vm9, %v529_v26, %v525_v21  ;;  %v517_v26 = vmul.f32 %v1394_v6, %v505_v36  ;;  %v628_v20 = vmul.f32 %v899_v18, %v617_v23 }
 0x10d   : > { %v545_v9 = vmul.f32 %v540_v52, %v533_v61  ;;  %v546_v21 = vmul.f32 %v544_v14, %v535_v62  ;;  %v522_v61 = vadd.f32 %v518_v42, %v481_v32  ;;  %v523_v62 = vadd.f32 %v519_v45, %v482_v30  ;;  %v664_v32 = vld [vmem:[%s1577_s3 + $0x8] sm:$0xff]  ;;  %v666_v30 = vld [vmem:[%s1577_s3 + $0x18] sm:$0xff] }
 0x10e   : > { %v521_v48 = vadd.f32 %v517_v26, %v480_v25  ;;  %v652_v25 = vpop.permute.xlu0 %651 }
 0x10f   : > { %v1421_v44 = vpop.permute.xlu1 %632  ;;  %v557_v33 = vmul.f32 %v1398_v10, %v545_v9  ;;  %v558_v6 = vmul.f32 %v1398_v10, %v546_v21  ;;  %v615_v10 = vsel %vm614_vm10, %v607_v54, %v611_v27  ;;  %v559_v54 = vmul.f32 %v1400_v11, %v547_v50 }
 0x110   : > { %v627_v60 = vmul.f32 %v898_v46, %v615_v10 }
 0x111   : > { %v561_v13 = vadd.f32 %v557_v33, %v520_v47 }
 0x112   : > { %v639_v14 = vmul.f32 %v1421_v44, %v627_v60  ;;  %v679_v7 = vpop.permute.xlu0 %678 }
 0x113   : > { %v566_v15 = vpop.permute.xlu1 %565 }
 0x114   : > { %v574_v43 = vsel %vm573_vm11, %v566_v15, %v570_v34  ;;  %v576_v2 = vsel %vm573_vm11, %v570_v34, %v566_v15  ;;  %v562_v15 = vadd.f32 %v558_v6, %v521_v48 }
 0x115   : > { %v586_v28 = vmul.f32 %v581_v37, %v574_v43  ;;  %v587_v31 = vmul.f32 %v585_v58, %v576_v2  ;;  %v563_v2 = vadd.f32 %v559_v54, %v522_v61 }
 0x117   : > { %v568_v3 = vpop.permute.xlu1 %567  ;;  %v598_v49 = vmul.f32 %v1402_v12, %v586_v28  ;;  %v599_v59 = vmul.f32 %v1402_v12, %v587_v31  ;;  %v665_v31 = vld [vmem:[%s1577_s3 + $0x10] sm:$0xff] }
 0x119   : > { %v602_v63 = vadd.f32 %v598_v49, %v561_v13  ;;  %v603_v36 = vadd.f32 %v599_v59, %v562_v15 }
 0x11b   : > { %v572_v8 = vpop.permute.xlu1 %571  ;;  %v643_v11 = vadd.f32 %v639_v14, %v602_v63 }
 0x11c   : > { %v575_v34 = vsel %vm573_vm11, %v568_v3, %v572_v8  ;;  %v577_v39 = vsel %vm573_vm11, %v572_v8, %v568_v3  ;;  %v564_v3 = vadd.f32 %v560_v0, %v523_v62 }
 0x11d   : > { %v588_v53 = vmul.f32 %v581_v37, %v575_v34  ;;  %v589_v35 = vmul.f32 %v585_v58, %v577_v39  ;;  %v640_v37 = vmul.f32 %v1421_v44, %v628_v20  ;;  %v659_v56 = vadd.f32 %v652_v25, %v643_v11 }
 0x11f   : > { %v609_v16 = vpop.permute.xlu1 %608  ;;  %v600_v40 = vmul.f32 %v1406_v22, %v588_v53  ;;  %v601_v12 = vmul.f32 %v1406_v22, %v589_v35  ;;  %v644_v4 = vadd.f32 %v640_v37, %v603_v36 }
 0x121   : > { %v604_v9 = vadd.f32 %v600_v40, %v563_v2  ;;  %v605_v21 = vadd.f32 %v601_v12, %v564_v3  ;;  %v660_v57 = vadd.f32 %v652_v25, %v644_v4 }
 0x123   : > { %v613_v52 = vpop.permute.xlu1 %612 }
 0x124   : > { %v616_v58 = vsel %vm614_vm10, %v609_v16, %v613_v52  ;;  %v618_v41 = vsel %vm614_vm10, %v613_v52, %v609_v16 }
 0x125   : > { %v629_v1 = vmul.f32 %v898_v46, %v616_v58  ;;  %v630_v43 = vmul.f32 %v899_v18, %v618_v41  ;;  %v689_v18 = vpop.permute.xlu0 %688 }
 0x127   : > { %v641_v5 = vmul.f32 %v1410_v24, %v629_v1  ;;  %v642_v22 = vmul.f32 %v1410_v24, %v630_v43  ;;  %v657_v19 = vpop.permute.xlu1 %656  ;;  %v663_v24 = vld [vmem:[%s1577_s3] sm:$0xff] }
 0x129   : > { %v645_v44 = vadd.f32 %v641_v5, %v604_v9  ;;  %v646_v17 = vadd.f32 %v642_v22, %v605_v21 }
 0x12b   : > { %v661_v38 = vadd.f32 %v657_v19, %v645_v44  ;;  %v662_v26 = vadd.f32 %v657_v19, %v646_v17  ;;  %v674_v55 = vpop.permute.xlu1 %673 }
 0x12d   : > { %v911_v27 = vpack.c.bf16 %v662_v26, %v660_v57  ;;  %v913_v28 = vpack.c.bf16 %v661_v38, %v659_v56 }
 0x12f   : > { %912 = vmatprep.subr.bf16.mxu0 %v911_v27  ;;  %915 = vmatprep.subr.bf16.mxu1 %v911_v27  ;;  %v684_v8 = vpop.permute.xlu1 %683 }
 0x130   : > { %914 = vmatpush1.bf16.msra.mxu0 %v913_v28  ;;  %916 = vmatpush1.bf16.msra.mxu1 %v913_v28 }
 0x133   : > { %900 = vmatmul.mubr.msk.f32.vlgmr.msra.gmra.mrb[0].mxu0 %vm691_vm12, %v663_v24  ;;  %902 = vmatmul.mubr.msk.f32.vlgmr.msra.gmra.mrb[0].mxu1 %vm691_vm12, %v665_v31 }
 0x134   : > { %774 = vmatprep.mubr.f32.mxu0 %v1121_v29  ;;  %786 = vmatprep.mubr.f32.mxu1 %v1121_v29 }
 0x137   : > { %901 = vmatmul.mubr.msk.f32.gmra.mrb[2].mxu0 %vm691_vm12, %v664_v32  ;;  %903 = vmatmul.mubr.msk.f32.gmra.mrb[2].mxu1 %vm691_vm12, %v666_v30 }
 0x206   : > { %v770_v33 = vpop.f32.mrb[0].mxu0  ;;  %v782_v6 = vpop.f32.mrb[0].mxu1 }
 0x207   : > { %v771_v29 = vadd.f32 %v770_v33, %v674_v55  ;;  %v783_v34 = vadd.f32 %v782_v6, %v684_v8  ;;  %v772_v39 = vpop.f32.mrb[1].mxu0  ;;  %v784_v42 = vpop.f32.mrb[1].mxu1 }
 0x208   : > { %v773_v45 = vadd.f32 %v772_v39, %v674_v55  ;;  %v785_v46 = vadd.f32 %v784_v42, %v684_v8 }
 0x209   : > { %793 = vst [vmem:[%s259_s12] sm:$0xff] %v771_v29  ;;  %797 = vst [vmem:[%s259_s12 + $0x20] sm:$0xff] %v783_v34 }
 0x20a   : > { %794 = vst [vmem:[%s259_s12 + $0x8] sm:$0xff] %v773_v45  ;;  %798 = vst [vmem:[%s259_s12 + $0x28] sm:$0xff] %v785_v46  ;;  %v776_v10 = vpop.f32.mrb[2].mxu0  ;;  %v788_v23 = vpop.f32.mrb[2].mxu1 }
 0x20b   : > { %v777_v47 = vadd.f32 %v776_v10, %v679_v7  ;;  %v789_v48 = vadd.f32 %v788_v23, %v689_v18  ;;  %v778_v49 = vpop.f32.mrb[3].mxu0  ;;  %v790_v59 = vpop.f32.mrb[3].mxu1 }
 0x20c   : > { %v779_v50 = vadd.f32 %v778_v49, %v679_v7  ;;  %v791_v51 = vadd.f32 %v790_v59, %v689_v18 }
 0x20d   : > { %795 = vst [vmem:[%s259_s12 + $0x10] sm:$0xff] %v777_v47  ;;  %799 = vst [vmem:[%s259_s12 + $0x30] sm:$0xff] %v789_v48 }
 0x20e   : > { %796 = vst [vmem:[%s259_s12 + $0x18] sm:$0xff] %v779_v50  ;;  %800 = vst [vmem:[%s259_s12 + $0x38] sm:$0xff] %v791_v51 }
 0x20f   : > { %1046 = shalt.err (!%p1043_p7)
}
 0x210   : > { %s1047_s26 = scalar_lea.hbm %s1528_s25, 1024  ;;  %s1051_s10 = scalar_lea.hbm %s1580_s6, 2048 }
 0x211   : > { %p1048_p8 = scmp.ne.s32.totalorder %s1528_s25, %s1047_s26  ;;  %p1052_p1 = scmp.lt.u32.totalorder %s1528_s25, %s1580_s6 }
 0x212   : > { %p1053_p0 = scmp.lt.u32.totalorder %s1051_s10, %s1047_s26  ;;  %p1055_p6 = scmp.lt.u32.totalorder %s1047_s26, %s1528_s25 }
 0x213   : > { %p1049_p11 = pnand %p1048_p8, %p1591_p9 }
 0x214   : > { %p1054_p5 = por %p1053_p0, %p1052_p1 }
 0x215   : > { %p1050_p13 = pneg %p1049_p11 }
 0x216   : > { %p1056_p10 = por %p1055_p6, %p1054_p5 }
 0x218   : > { %p1057_p12 = pnand %p1056_p10, %p1050_p13 }
 0x21a   : > { %1060 = shalt.err (!%p1057_p12)
}
 0x21b   : > { %s1123_s14 = smov 256  }
 0x21c   : > { %921 = dma.vmem_to_hbm [thread:$0]  (%p1591_p9), %s1523_s13, 1024, %s1528_s25, %s1532_s15, %s1123_s14, %s1123_s14, %s1109_s16  }
 0x21d PF: > { %p933_p2 = scmp.ge.s32.totalorder %s1099_s24, 2  ;;  %s830_s9 = sand.u32 1, %s1087_s21  }
 0x21e   : > { %p1592_p3 = scmp.ne.s32.totalorder %s1585_s8, 0  ;;  %s831_s17 = scalar_lea.sflag [#allocation4], %s830_s9 }
 0x220   : > { %p928_p4 = pnand %p933_p2, %p1592_p3 }
 0x222   : > { %1082 = dma.done.wait (!%p928_p4), %s831_s17, 1024  }
 0x223   : > { %1084 = vsyncadd (!%p928_p4), %s831_s17, 4294966272  ;;  %p17_p7 = scmp.ge.s32.totalorder %s1184_s27, 4   ;;  %s1593_s21 = smov %s1091_s22 }
 0x224   : > { %s1594_s22 = smov %s1095_s23  ;;  %s1595_s23 = smov %s1195_s30 }
 0x225   : > { %s1596_s24 = smov %s1184_s27  ;;  %19 = sbr.rel (!%p17_p7) target bundleno = 4 (0x4), region = 84 }
 0x22c   :  { %836 = vsyncpa [#allocation3], 1 }
 0x22d   :  { %838 = vsyncpa [#allocation3 + $0x1], 1 }
 0x22e   :  { %839 = vsyncpa [#allocation4], 1 }
 0x22f   :  { %841 = vsyncpa [#allocation4 + $0x1], 1 }

</bundles_post_ra>
